<compile_context>
chip_gen: v6e
topology: v6e:2x2x1
jax: 0.10.0
libtpu: 0.0.40
codegen_flags: <defaults>
</compile_context>

<pallas_src>
import functools
import math

import numpy as np
import jax
import jax.numpy as jnp
from jax.experimental import pallas as pl
from jax.experimental.pallas import tpu as pltpu


VMEM_LIMIT = 48 * 1024 * 1024      # safe on v7x (64 MiB phys); headroom on v5e/v6e


def _round_up(v, m):
    return (v + m - 1) // m * m


def _choose_div(v, cap, step):
    """Largest multiple-of-`step` divisor of `v` that is <= cap (v % step == 0)."""
    if v <= cap:
        return v
    t = cap - (cap % step)
    while t >= step:
        if v % t == 0:
            return t
        t -= step
    return step


def _sigmoid(x):
    return 1.0 / (1.0 + jnp.exp(-x))


def _epilogue(r, act, res, res_op):
    """Shared fused epilogue: activation + residual combine (f32 values)."""
    if act == "relu":
        r = jnp.maximum(r, 0.0)
    elif act == "sigmoid":
        r = _sigmoid(r)
    if res_op == "add":
        r = r + res
    elif res_op == "mul":
        r = r * res
    elif res_op == "mul_sigmoid":      # res * sigmoid(conv)
        r = res * _sigmoid(r)
    elif res_op == "add_sigmoid":      # sigmoid(conv + res)
        r = _sigmoid(r + res)
    return r


# ---------------------------------------------------------------------------
# Pallas kernels
# ---------------------------------------------------------------------------
def _mm_kernel(*refs, act, res_op):
    if res_op is None:
        a_ref, b_ref, bias_ref, o_ref, acc_ref = refs
        res_ref = None
    else:
        a_ref, b_ref, bias_ref, res_ref, o_ref, acc_ref = refs

    k = pl.program_id(2)

    @pl.when(k == 0)
    def _():
        acc_ref[...] = jnp.zeros_like(acc_ref)

    acc_ref[...] += jnp.dot(a_ref[...], b_ref[...],
                            preferred_element_type=jnp.float32)

    @pl.when(k == pl.num_programs(2) - 1)
    def _():
        res_val = None if res_ref is None else res_ref[...].astype(jnp.float32)
        r = _epilogue(acc_ref[...] + bias_ref[...], act, res_val, res_op)
        o_ref[...] = r.astype(o_ref.dtype)


@functools.partial(jax.jit,
                   static_argnames=("o", "act", "res_op", "out_dtype"))
def matmul_bias(a, wt, bias, res=None, *, o, act="none", res_op=None,
                out_dtype=jnp.bfloat16):
    """(M, K) @ pre-packed (Kp, Np) bf16 weight + bias, fused act/residual.

    Weights/bias are packed & padded at parameter construction time.  bf16 MXU
    inputs, f32 accumulation; grid (M, N, K) with K innermost.
    """
    assert not (act == "sigmoid" and res_op in ("mul_sigmoid", "add_sigmoid"))
    assert (res is None) == (res_op is None)
    M, K = a.shape
    Kp, Np = wt.shape

    if M < 32:
        # Tiny matmuls (pooled 1x1 convs, bottleneck layers): plain XLA beats
        # the Pallas pad/launch overhead here.
        ab = a.astype(jnp.bfloat16)
        if K != Kp:
            ab = jnp.pad(ab, ((0, 0), (0, Kp - K)))
        r = jnp.dot(ab, wt, preferred_element_type=jnp.float32)[:, :o]
        r = r + bias[0, :o]
        res_val = None if res is None else res.astype(jnp.float32)
        return _epilogue(r, act, res_val, res_op).astype(out_dtype)

    Mp = _round_up(M, 8)
    tm = _choose_div(Mp, 1024, 8)
    tk = _choose_div(Kp, 512, 128)
    tn = _choose_div(Np, 512, 128)
    # v7x has 2 TensorCores: make sure at least one parallel axis has >=2 blocks.
    if Mp // tm == 1 and Np // tn == 1:
        if Mp % 16 == 0:
            tm = Mp // 2
        elif Np % 256 == 0:
            tn = Np // 2

    ab = a if a.dtype == jnp.bfloat16 else a.astype(jnp.bfloat16)
    if (M, K) != (Mp, Kp):
        ab = jnp.pad(ab, ((0, Mp - M), (0, Kp - K)))

    operands = [ab, wt, bias]
    in_specs = [
        pl.BlockSpec((tm, tk), lambda i, j, k: (i, k)),
        pl.BlockSpec((tk, tn), lambda i, j, k: (k, j)),
        pl.BlockSpec((1, tn), lambda i, j, k: (0, j)),
    ]
    if res_op is not None:
        rp = res if (M, o) == (Mp, Np) else jnp.pad(
            res, ((0, Mp - M), (0, Np - o)))
        operands.append(rp)
        in_specs.append(pl.BlockSpec((tm, tn), lambda i, j, k: (i, j)))

    out = pl.pallas_call(
        functools.partial(_mm_kernel, act=act, res_op=res_op),
        out_shape=jax.ShapeDtypeStruct((Mp, Np), out_dtype),
        grid=(Mp // tm, Np // tn, Kp // tk),
        in_specs=in_specs,
        out_specs=pl.BlockSpec((tm, tn), lambda i, j, k: (i, j)),
        scratch_shapes=[pltpu.VMEM((tm, tn), jnp.float32)],
        compiler_params=pltpu.CompilerParams(
            dimension_semantics=("parallel", "parallel", "arbitrary"),
            vmem_limit_bytes=VMEM_LIMIT),
    )(*operands)
    if (M, o) != (Mp, Np):
        out = out[:M, :o]
    return out


def _dw_kernel(*refs, kk, has_res):
    if has_res:
        x_ref, w_ref, b_ref, r_ref, o_ref = refs
    else:
        x_ref, w_ref, b_ref, o_ref = refs
        r_ref = None
    acc = x_ref[0].astype(jnp.float32) * w_ref[0].astype(jnp.float32)
    for t in range(1, kk):
        acc = acc + x_ref[t].astype(jnp.float32) * w_ref[t].astype(jnp.float32)
    r = acc + b_ref[...]
    if has_res:
        r = r + r_ref[...].astype(jnp.float32)
    o_ref[...] = r.astype(o_ref.dtype)


def _ew_compute(op, vals):
    if op == "relu":
        return jnp.maximum(vals[0], 0.0)
    if op == "add":
        return vals[0] + vals[1]
    if op == "mul":
        return vals[0] * vals[1]
    if op == "add_sigmoid":
        return _sigmoid(vals[0] + vals[1])
    if op == "addmul":                              # (x + y) * z
        return (vals[0] + vals[1]) * vals[2]
    raise ValueError(op)


def _ew_kernel(*refs, op):
    o_ref = refs[-1]
    vals = [r[...].astype(jnp.float32) for r in refs[:-1]]
    o_ref[...] = _ew_compute(op, vals).astype(o_ref.dtype)


@functools.partial(jax.jit, static_argnames=("op",))
def ew(op, *xs):
    """Element-wise op on same-shape tensors (row-tiled Pallas kernel).

    Operates on the natural (M, C) layout; no flatten / pad / slice copies.
    Odd shapes (C not a 128-multiple) fall back to fused jnp.
    """
    shape, out_dtype = xs[0].shape, xs[0].dtype
    C = shape[-1]
    M = xs[0].size // C
    if C % 128 != 0 or M % 8 != 0:
        vals = [v.astype(jnp.float32) for v in xs]
        return _ew_compute(op, vals).astype(out_dtype)
    xs2 = [v.reshape(M, C) for v in xs]
    tm = _choose_div(M, 512, 8)
    out = pl.pallas_call(
        functools.partial(_ew_kernel, op=op),
        out_shape=jax.ShapeDtypeStruct((M, C), out_dtype),
        grid=(M // tm,),
        in_specs=[pl.BlockSpec((tm, C), lambda i: (i, 0)) for _ in xs2],
        out_specs=pl.BlockSpec((tm, C), lambda i: (i, 0)),
        compiler_params=pltpu.CompilerParams(
            dimension_semantics=("parallel",),
            vmem_limit_bytes=VMEM_LIMIT),
    )(*xs2)
    return out.reshape(shape)


# ---------------------------------------------------------------------------
# Conv wrappers (im2col glue in JAX, matmul/tap-sum in Pallas).  NHWC layout.
# ---------------------------------------------------------------------------
@functools.partial(jax.jit,
                   static_argnames=("o", "k", "act", "res_op", "out_dtype"))
def _conv2d_impl(x, wt, bias, res, *, o, k, act="none", res_op=None,
                 out_dtype=jnp.bfloat16):
    """stride-1 'same' 2-D conv, NHWC activations, pre-packed weights."""
    N, H, W, C = x.shape
    kh, kw = k
    if kh == 1 and kw == 1:
        cols = x.reshape(N * H * W, C)
    else:
        xb = x.astype(jnp.bfloat16)
        ph, pw_ = kh // 2, kw // 2
        xp = jnp.pad(xb, ((0, 0), (ph, ph), (pw_, pw_), (0, 0)))
        # TODO(synk): bf16 taps are still materialized in HBM (kh*kw blow-up);
        # stream them per-tile inside the matmul kernel in a future revision.
        taps = [xp[:, i:i + H, j:j + W, :] for i in range(kh) for j in range(kw)]
        patches = jnp.stack(taps, axis=-1)                  # (N, H, W, C, KK)
        cols = patches.reshape(N * H * W, C * kh * kw)
    rflat = None if res is None else res.reshape(N * H * W, o)
    out = matmul_bias(cols, wt, bias, rflat, o=o, act=act, res_op=res_op,
                      out_dtype=out_dtype)
    return out.reshape(N, H, W, o)


def conv2d(x, p, act="none", res=None, res_op=None, out_dtype=jnp.bfloat16):
    return _conv2d_impl(x, p["wt"], p["b"], res, o=p["o"], k=p["k"],
                        act=act, res_op=res_op, out_dtype=out_dtype)


@functools.partial(jax.jit, static_argnames=("k", "out_dtype"))
def _depthwise_impl(x, wdw, bias, res, *, k, out_dtype=jnp.bfloat16):
    """stride-1 'same' depthwise conv (groups == channels), NHWC, bf16 taps."""
    N, H, W, C = x.shape
    kh, kw = k
    KK = kh * kw
    ph, pw_ = kh // 2, kw // 2
    xb = x.astype(jnp.bfloat16)
    xp = jnp.pad(xb, ((0, 0), (ph, ph), (pw_, pw_), (0, 0)))
    # TODO(synk): taps (KK-fold blow-up, bf16) are still materialized; a haloed
    # manual-DMA spatial block would remove this HBM traffic entirely.
    taps = jnp.stack(
        [xp[:, i:i + H, j:j + W, :] for i in range(kh) for j in range(kw)],
        axis=0).reshape(KK, N * H * W, C)

    M = N * H * W
    Cp = wdw.shape[-1]
    Mp = _round_up(M, 8)
    budget = 8 * 1024 * 1024                     # bytes for the bf16 taps block
    tm_cap = max(8, (budget // (KK * Cp * 2)) // 8 * 8)
    tm = _choose_div(Mp, min(512, tm_cap), 8)

    if (M, C) != (Mp, Cp):
        taps = jnp.pad(taps, ((0, 0), (0, Mp - M), (0, Cp - C)))
    rflat = None
    if res is not None:
        rflat = res.reshape(M, C)
        if (M, C) != (Mp, Cp):
            rflat = jnp.pad(rflat, ((0, Mp - M), (0, Cp - C)))

    operands = [taps, wdw, bias]
    in_specs = [
        pl.BlockSpec((KK, tm, Cp), lambda i: (0, i, 0)),
        pl.BlockSpec((KK, 1, Cp), lambda i: (0, 0, 0)),
        pl.BlockSpec((1, Cp), lambda i: (0, 0)),
    ]
    if rflat is not None:
        operands.append(rflat)
        in_specs.append(pl.BlockSpec((tm, Cp), lambda i: (i, 0)))

    out = pl.pallas_call(
        functools.partial(_dw_kernel, kk=KK, has_res=res is not None),
        out_shape=jax.ShapeDtypeStruct((Mp, Cp), out_dtype),
        grid=(Mp // tm,),
        in_specs=in_specs,
        out_specs=pl.BlockSpec((tm, Cp), lambda i: (i, 0)),
        compiler_params=pltpu.CompilerParams(
            dimension_semantics=("parallel",),
            vmem_limit_bytes=VMEM_LIMIT),
    )(*operands)
    if (M, C) != (Mp, Cp):
        out = out[:M, :C]
    return out.reshape(N, H, W, C)


def depthwise_conv2d(x, p, res=None, out_dtype=jnp.bfloat16):
    return _depthwise_impl(x, p["w"], p["b"], res, k=p["k"], out_dtype=out_dtype)


@functools.partial(jax.jit, static_argnames=("k",))
def _deform_cols(x, om, k):
    """Modulated deformable im2col (torchvision.ops.deform_conv2d), NHWC.

    Returns bf16 columns (the largest activation tensor of the model)."""
    N, H, W, C = x.shape
    KK = k * k
    om = om.astype(jnp.float32)
    o1, o2, m_log = om[..., :KK], om[..., KK:2 * KK], om[..., 2 * KK:3 * KK]
    offset = jnp.concatenate([o1, o2], axis=-1)             # (N, H, W, 2*KK)
    dy = offset[..., 0::2]
    dx = offset[..., 1::2]
    mask = jax.nn.sigmoid(m_log)

    ki, kj = jnp.meshgrid(jnp.arange(k), jnp.arange(k), indexing="ij")
    ki = ki.reshape(KK).astype(jnp.float32)
    kj = kj.reshape(KK).astype(jnp.float32)
    pad = k // 2
    py = (jnp.arange(H, dtype=jnp.float32)[None, :, None, None]
          + ki[None, None, None, :] - pad + dy)             # (N, H, W, KK)
    px = (jnp.arange(W, dtype=jnp.float32)[None, None, :, None]
          + kj[None, None, None, :] - pad + dx)
    valid = (py > -1) & (px > -1) & (py < H) & (px < W)
    y0 = jnp.floor(py)
    x0 = jnp.floor(px)
    ty = py - y0
    tx = px - x0
    xf = x.reshape(N, H * W, C)

    def corner(yi, xi, wgt):
        inb = (yi >= 0) & (yi < H) & (xi >= 0) & (xi < W)
        yc = jnp.clip(yi, 0, H - 1).astype(jnp.int32)
        xc = jnp.clip(xi, 0, W - 1).astype(jnp.int32)
        idx = (yc * W + xc).reshape(N, H * W * KK, 1)
        g = jnp.take_along_axis(xf, idx, axis=1)            # (N, H*W*KK, C)
        g = g.reshape(N, H, W, KK, C).astype(jnp.float32)
        return g * (wgt * inb.astype(jnp.float32))[..., None]

    val = (corner(y0, x0, (1 - ty) * (1 - tx))
           + corner(y0, x0 + 1, (1 - ty) * tx)
           + corner(y0 + 1, x0, ty * (1 - tx))
           + corner(y0 + 1, x0 + 1, ty * tx))
    val = val * (valid.astype(jnp.float32) * mask)[..., None]
    # -> K ordering (c, tap) to match the packed weight layout.
    return (val.transpose(0, 1, 2, 4, 3)
            .reshape(N * H * W, C * KK).astype(jnp.bfloat16))


def deform_conv2d(x, p, act="none", res=None, res_op=None,
                  out_dtype=jnp.bfloat16):
    main = p["main"]
    k = main["k"][0]
    om = conv2d(x, p["off"])                                # offset/mask conv
    cols = _deform_cols(x, om, k=k)
    N, H, W, _ = x.shape
    rflat = None if res is None else res.reshape(N * H * W, main["o"])
    out = matmul_bias(cols, main["wt"], main["b"], rflat, o=main["o"],
                      act=act, res_op=res_op, out_dtype=out_dtype)
    return out.reshape(N, H, W, main["o"])


# ---------------------------------------------------------------------------
# Plain-JAX glue ops (NHWC)
# ---------------------------------------------------------------------------
@functools.partial(jax.jit, static_argnames=("r",))
def pixel_shuffle(x, r):
    N, H, W, C = x.shape
    x = x.reshape(N, H, W, C // (r * r), r, r).transpose(0, 1, 4, 2, 5, 3)
    return x.reshape(N, H * r, W * r, C // (r * r))


@functools.partial(jax.jit, static_argnames=("r",))
def pixel_unshuffle(x, r):
    N, H, W, C = x.shape
    x = x.reshape(N, H // r, r, W // r, r, C).transpose(0, 1, 3, 5, 2, 4)
    return x.reshape(N, H // r, W // r, C * r * r)


@jax.jit
def avg_pool2(x):
    N, H, W, C = x.shape
    return x.reshape(N, H // 2, 2, W // 2, 2, C).mean(axis=(2, 4))


@jax.jit
def max_pool2(x):
    N, H, W, C = x.shape
    return x.reshape(N, H // 2, 2, W // 2, 2, C).max(axis=(2, 4))


@jax.jit
def grouped_1x1(x, w, b):
    """Conv2d(C, m*C, kernel_size=1, groups=C), NHWC (group-major outputs)."""
    C = x.shape[-1]
    O = w.shape[0]
    m = O // C
    xr = jnp.repeat(x, m, axis=-1)
    return (xr * w + b).astype(x.dtype)


def _cubic_taps(out_size, in_size):
    A = -0.75
    scale = in_size / out_size
    j = np.arange(out_size, dtype=np.float64)
    src = (j + 0.5) * scale - 0.5
    f = np.floor(src)
    t = src - f

    def k1(d):
        return ((A + 2) * d - (A + 3)) * d * d + 1

    def k2(d):
        return ((A * d - 5 * A) * d + 8 * A) * d - 4 * A

    wts = np.stack([k2(t + 1), k1(t), k1(1 - t), k2(2 - t)], axis=1)
    idx = np.clip(np.stack([f - 1, f, f + 1, f + 2], axis=1), 0, in_size - 1)
    return jnp.asarray(idx.astype(np.int32)), jnp.asarray(wts.astype(np.float32))


@functools.partial(jax.jit, static_argnames=("out_h", "out_w"))
def bicubic_resize(x, out_h, out_w):
    """F.interpolate(mode='bicubic', align_corners=False), NHWC."""
    _, H, W, _ = x.shape
    iy, wy = _cubic_taps(out_h, H)
    ix, wx = _cubic_taps(out_w, W)
    xh = x[:, iy, :, :]                                     # (N, out_h, 4, W, C)
    xh = jnp.einsum("nhkwc,hk->nhwc", xh, wy)
    xw = xh[:, :, ix, :]                                    # (N, out_h, out_w, 4, C)
    return jnp.einsum("nhwkc,wk->nhwc", xw, wx)


# ---------------------------------------------------------------------------
# Parameter construction & one-time packing (shapes mirror the PyTorch init)
# ---------------------------------------------------------------------------
def pack_dense(w, b):
    """OIHW f32 weight -> pre-transposed, 128-padded, bf16 (K, N) + f32 bias."""
    O, Cin, kh, kw = w.shape
    K = Cin * kh * kw
    Kp, Np = _round_up(K, 128), _round_up(O, 128)
    wt = (jnp.zeros((Kp, Np), jnp.bfloat16)
          .at[:K, :O].set(w.reshape(O, K).T.astype(jnp.bfloat16)))
    bp = jnp.zeros((1, Np), jnp.float32).at[0, :O].set(b.astype(jnp.float32))
    return {"wt": wt, "b": bp, "o": int(O), "k": (int(kh), int(kw))}


def pack_dw(w, b):
    """(C,1,kh,kw) depthwise weight -> (KK, 1, Cp) bf16 taps + f32 bias."""
    C, _, kh, kw = w.shape
    KK = kh * kw
    Cp = _round_up(C, 128)
    wp = (jnp.zeros((KK, 1, Cp), jnp.bfloat16)
          .at[:, 0, :C].set(w.reshape(C, KK).T.astype(jnp.bfloat16)))
    bp = jnp.zeros((1, Cp), jnp.float32).at[0, :C].set(b.astype(jnp.float32))
    return {"w": wp, "b": bp, "k": (int(kh), int(kw))}


class ParamGen:
    def __init__(self, seed=0):
        self._key = jax.random.PRNGKey(seed)
        self._n = 0

    def _next(self):
        self._n += 1
        return jax.random.fold_in(self._key, self._n)

    def conv(self, out_c, in_c, k, zero=False):
        shape = (out_c, in_c, k, k)
        if zero:
            w = jnp.zeros(shape, jnp.float32)
        else:
            std = 0.3 / math.sqrt(in_c * k * k)
            w = std * jax.random.normal(self._next(), shape, dtype=jnp.float32)
        return pack_dense(w, jnp.zeros((out_c,), jnp.float32))

    def dwconv(self, c, k):
        std = 0.3 / math.sqrt(k * k)
        w = std * jax.random.normal(self._next(), (c, 1, k, k), dtype=jnp.float32)
        return pack_dw(w, jnp.zeros((c,), jnp.float32))

    def grouped1x1(self, c, m):
        w = 0.3 * jax.random.normal(self._next(), (m * c,), dtype=jnp.float32)
        return {"w": w, "b": jnp.zeros((m * c,), jnp.float32)}

    def dconv(self, in_c, out_c, k):
        return {"dw": self.dwconv(in_c, k), "pw": self.conv(out_c, in_c, 1)}

    def deform(self, in_c, out_c, k=3):
        # conv_offset_mask is zero-initialized in the PyTorch module.
        return {"main": self.conv(out_c, in_c, k),
                "off": self.conv(3 * k * k, in_c, k, zero=True)}


def make_autoencoder(pg, in_c, out_c, expansion=4):
    e = expansion * in_c
    return {"conv_in": pg.conv(e, in_c, 7),
            "enc1": pg.dconv(e, e, 7),
            "enc2": pg.dconv(4 * e, e, 7),
            "dec1": pg.dconv(4 * e, 4 * e, 7),
            "dec2": pg.dconv(e, 4 * e, 7),
            "conv_out": pg.conv(out_c, e, 3)}


def make_rdb(pg, in_c, gr, nl):
    return {"layers": [pg.conv(gr, in_c + gr * i, 3) for i in range(nl)],
            "lff": pg.conv(gr, in_c + gr * nl, 1)}


def make_rdn(pg, nc, nf, gr, nb, nl):
    return {"sf1": pg.conv(nf, nc, 7),
            "sf2": pg.conv(nf, nf, 7),
            "rdbs": [make_rdb(pg, nf, gr, nl)]
                    + [make_rdb(pg, gr, gr, nl) for _ in range(nb - 1)],
            "gff1": pg.conv(nf, gr * nb, 1),
            "gff2": pg.conv(nf, nf, 3)}


def make_dpca(pg, in_c, out_c):
    return {"h": pg.conv(out_c, in_c, 1),
            "v": pg.conv(out_c, in_c, 1),
            "f": pg.conv(out_c, in_c, 1)}


def make_tfam(pg, c=128, nf=256):
    return {"convIn": pg.dconv(c, nf, 3),
            "dpca": make_dpca(pg, nf, 2 * nf),
            "pos1": pg.deform(2 * nf, 4 * nf),
            "pos2": pg.deform(nf, 2 * nf),
            "ca_g": pg.grouped1x1(nf, 2),
            "ca_d1": pg.deform(8 * nf, 8 * nf),
            "ca_d2": pg.deform(2 * nf, nf),
            "convOut": pg.dconv(2 * nf, c, 3)}


def make_arb(pg, in_c, gr=128):
    return {"d1": pg.deform(in_c, gr),
            "d2": pg.deform(gr, gr),
            "d3": pg.deform(gr, in_c),
            "adp": pg.conv(4 * in_c, in_c, 1),
            "convOut": pg.dwconv(in_c, 3)}


def make_rcb(pg, cin, out_c, nl=3):
    pw = [pg.conv(2 ** (i + 1) * cin, 2 ** (i + 1) * cin, 1) for i in range(nl - 1)]
    pw.append(pg.conv(out_c, 2 ** nl * cin, 1))
    return {"pw": pw,
            "block": [make_arb(pg, 2 ** i * cin) for i in range(nl)],
            # TODO(synk): PyTorch re-creates this 1x1 conv with fresh random
            # weights on every forward(); here it is a fixed deterministic param.
            "fresh": pg.conv(out_c, out_c, 1)}


def make_rm(pg, cin=128, out_c=128, nl=3):
    pw = [pg.conv(2 ** (i + 1) * cin, 2 ** (i + 1) * cin, 1) for i in range(nl - 1)]
    pw.append(pg.conv(out_c, 2 ** nl * cin, 1))
    return {"pw": pw,
            "block": [make_rcb(pg, 2 ** i * cin, 2 ** i * cin) for i in range(nl)]}


def make_cgnet(pg, in_channels):
    return {"tfam": make_tfam(pg, 128, 256),
            "ae": make_autoencoder(pg, in_channels, 128),
            "rdn1": make_rdn(pg, 128, 128, 128, 18, 4),
            "rm": make_rm(pg, 128, 128, 3),
            "fm": pg.conv(128, 128, 3),
            "rdn2": make_rdn(pg, 128, 128, 128, 18, 4),
            "conv1": pg.conv(128, 128, 3),
            "up": pg.conv(128 * 4, 128, 3),
            "out": pg.conv(3, 128, 3)}


# ---------------------------------------------------------------------------
# Forward pass (mirrors the PyTorch graph; activations NHWC bf16)
# ---------------------------------------------------------------------------
def dconv_fwd(p, x, act="none", res=None, res_op=None):
    h = depthwise_conv2d(x, p["dw"])
    return conv2d(h, p["pw"], act=act, res=res, res_op=res_op)


def autoencoder_fwd(p, x):
    _, h, w, _ = x.shape
    if h % 4 != 0:
        x = jnp.pad(x, ((0, 0), (0, 4 - h % 4), (0, 0), (0, 0)))
    if w % 4 != 0:
        x = jnp.pad(x, ((0, 0), (0, 0), (0, 4 - w % 4), (0, 0)))
    conv_in = conv2d(x, p["conv_in"])
    # ReLU commutes with pixel (un)shuffle, so it is fused into the DConv.
    e = pixel_unshuffle(dconv_fwd(p["enc1"], conv_in, act="relu"), 2)
    e = pixel_unshuffle(dconv_fwd(p["enc2"], e, act="relu"), 2)
    d = pixel_shuffle(dconv_fwd(p["dec1"], e, act="relu"), 2)
    d = pixel_shuffle(dconv_fwd(p["dec2"], d, act="relu"), 2)
    out = ew("add", conv_in, d)
    return conv2d(out, p["conv_out"])


def rdb_fwd(p, x):
    y = x
    for lp in p["layers"]:
        y = jnp.concatenate([y, conv2d(y, lp, act="relu")], axis=-1)
    return conv2d(y, p["lff"], res=x, res_op="add")


def rdn_fwd(p, x):
    sfe1 = conv2d(x, p["sf1"])
    x = conv2d(sfe1, p["sf2"])
    feats = []
    for bp in p["rdbs"]:
        x = rdb_fwd(bp, x)
        feats.append(x)
    g = conv2d(jnp.concatenate(feats, axis=-1), p["gff1"])
    return conv2d(g, p["gff2"], res=sfe1, res_op="add")


def dpca_fwd(p, x):
    h = jnp.mean(x.astype(jnp.float32), axis=1, keepdims=True)   # pool over H
    v = jnp.mean(x.astype(jnp.float32), axis=2, keepdims=True)   # pool over W
    h = conv2d(h, p["h"], act="sigmoid")
    v = conv2d(v, p["v"], act="sigmoid")
    hv = h * v                                               # broadcast to full
    # h*v*sigmoid(conv_f) fused into the conv_f epilogue.
    return conv2d(x, p["f"], act="sigmoid", res=hv, res_op="mul")


def tfam_fwd(p, x):
    ci = dconv_fwd(p["convIn"], x, act="relu")
    dp = dpca_fwd(p["dpca"], ci)
    po = jnp.concatenate([avg_pool2(ci), max_pool2(ci)], axis=-1)
    po = deform_conv2d(po, p["pos1"])
    po = pixel_shuffle(po, 2)
    po = deform_conv2d(po, p["pos2"])
    ca = grouped_1x1(ci, p["ca_g"]["w"], p["ca_g"]["b"])
    ca = pixel_unshuffle(ca, 2)
    ca = deform_conv2d(ca, p["ca_d1"])
    ca = pixel_shuffle(ca, 2)
    ca = deform_conv2d(ca, p["ca_d2"])
    s = ew("addmul", jnp.concatenate([ca, ci], axis=-1), po, dp)
    # x * sigmoid(convOut(s)) fused into the pointwise conv epilogue.
    return dconv_fwd(p["convOut"], s, res=x, res_op="mul_sigmoid")


def arb_fwd(p, tfam_p, x):
    h = deform_conv2d(x, p["d1"], act="relu")
    h = deform_conv2d(h, p["d2"])
    h = tfam_fwd(tfam_p, h)
    h = ew("relu", h)
    h = deform_conv2d(h, p["d3"], res=x, res_op="add")       # BNpath(x) + x fused
    a = avg_pool2(x)
    a = conv2d(a, p["adp"], act="relu")
    a = pixel_shuffle(a, 2)
    # resPath + ADPpath fused into the depthwise-conv epilogue.
    return depthwise_conv2d(h, p["convOut"], res=a)


def rcb_fwd(p, tfam_p, x):
    for i in range(3):
        x = jnp.concatenate([arb_fwd(p["block"][i], tfam_p, x), x], axis=-1)
        x = conv2d(x, p["pw"][i])
    return conv2d(x, p["fresh"])                             # bias=False -> zero bias


def rm_fwd(p, tfam_p, x):
    for i in range(3):
        x = jnp.concatenate([rcb_fwd(p["block"][i], tfam_p, x), x], axis=-1)
    # PyTorch computes pw[i](x) every iteration but only returns the last one;
    # the intermediate results are unused, so only the last is computed here.
    return conv2d(x, p["pw"][2])


def fm_fwd(p, tfam_p, x, skip):
    t = tfam_fwd(tfam_p, x)
    return conv2d(t, p, res=skip, res_op="add")


def cgnet_forward(params, x_nchw):
    x = jnp.transpose(x_nchw, (0, 2, 3, 1))                  # NCHW -> NHWC
    orig_h, orig_w = 2 * x.shape[1], 2 * x.shape[2]
    inp = autoencoder_fwd(params["ae"], x)
    inp = rdn_fwd(params["rdn1"], inp)
    rm = rm_fwd(params["rm"], params["tfam"], inp)
    fm = fm_fwd(params["fm"], params["tfam"], rm, inp)
    ps1 = conv2d(fm, params["conv1"])
    ps1 = conv2d(ps1, params["up"])
    ps1 = pixel_shuffle(ps1, 2)
    ps1 = rdn_fwd(params["rdn2"], ps1)
    interp = bicubic_resize(x, orig_h, orig_w)
    if ps1.shape[1] == orig_h and ps1.shape[2] == orig_w:
        out = conv2d(ps1, params["out"], res=interp, res_op="add_sigmoid",
                     out_dtype=jnp.float32)                  # fused epilogue
    else:  # autoencoder padded H/W; slice before the final add+sigmoid
        out = conv2d(ps1, params["out"], out_dtype=jnp.float32)
        out = out[:, :orig_h, :orig_w, :]
        out = ew("add_sigmoid", out, interp)
    return jnp.transpose(out, (0, 3, 1, 2))                  # NHWC -> NCHW


if __name__ == "__main__":
    # Output conv produces 3 channels and is added to a bicubic upsample of x,
    # so args.in_channels must be 3.  Small spatial size (8x8) keeps the run fast.
    in_channels = 3
    x = jax.random.uniform(jax.random.PRNGKey(0), (1, in_channels, 8, 8),
                           dtype=jnp.float32)
    params = make_cgnet(ParamGen(0), in_channels)
    out = cgnet_forward(params, x)
    out = jax.block_until_ready(out)
    assert out.shape == (1, 3, 16, 16), out.shape
    assert bool(jnp.all(jnp.isfinite(out))), "non-finite output"
    print("KERNEL_OK")
</pallas_src>

<mosaic_0001>
module attributes {stable_mosaic.version = 11 : i64} {
  func.func @_mm_kernel(%arg0: i32, %arg1: i32, %arg2: i32, %arg3: memref<32x256xbf16, #tpu.memory_space<vmem>>, %arg4: memref<256x128xbf16, #tpu.memory_space<vmem>>, %arg5: memref<1x128xf32, #tpu.memory_space<vmem>>, %arg6: memref<32x128xbf16, #tpu.memory_space<vmem>>, %arg7: memref<32x128xf32, #tpu.memory_space<vmem>>) attributes {dimension_semantics = [#tpu.dimension_semantics<parallel>, #tpu.dimension_semantics<parallel>, #tpu.dimension_semantics<arbitrary>], iteration_bounds = array<i64: 2, 1, 1>, scalar_prefetch = 0 : i64, scratch_operands = 1 : i64, tpu.core_type = #tpu.core_type<tc>, window_params = [{transform_indices = @transform_0, window_bounds = array<i64: 32, 256>}, {transform_indices = @transform_1, window_bounds = array<i64: 256, 128>}, {transform_indices = @transform_2, window_bounds = array<i64: 1, 128>}, {transform_indices = @transform_3, window_bounds = array<i64: 32, 128>}]} {
    %c0_i32 = arith.constant 0 : i32
    %0 = arith.cmpi eq, %arg2, %c0_i32 : i32
    %1 = arith.extui %0 : i1 to i32
    %c0_i32_0 = arith.constant 0 : i32
    %2 = arith.cmpi ne, %1, %c0_i32_0 : i32
    scf.if %2 {
      %cst_10 = arith.constant 0.000000e+00 : f32
      %12 = vector.broadcast %cst_10 : f32 to vector<32x128xf32>
      %c0_11 = arith.constant 0 : index
      %c0_12 = arith.constant 0 : index
      %13 = vector.load %arg7[%c0_11, %c0_12] : memref<32x128xf32, #tpu.memory_space<vmem>>, vector<32x128xf32>
      tpu.vector_store %arg7[%c0_11, %c0_12], %12 {strides = array<i32>} : memref<32x128xf32, #tpu.memory_space<vmem>>, vector<32x128xf32>,
    } else {
    }
    %c0 = arith.constant 0 : index
    %c0_1 = arith.constant 0 : index
    %3 = vector.load %arg7[%c0, %c0_1] : memref<32x128xf32, #tpu.memory_space<vmem>>, vector<32x128xf32>
    %c0_2 = arith.constant 0 : index
    %c0_3 = arith.constant 0 : index
    %4 = vector.load %arg3[%c0_2, %c0_3] : memref<32x256xbf16, #tpu.memory_space<vmem>>, vector<32x256xbf16>
    %c0_4 = arith.constant 0 : index
    %c0_5 = arith.constant 0 : index
    %5 = vector.load %arg4[%c0_4, %c0_5] : memref<256x128xbf16, #tpu.memory_space<vmem>>, vector<256x128xbf16>
    %cst = arith.constant dense<0.000000e+00> : vector<32x128xf32>
    %6 = tpu.matmul %4, %5, %cst {dimension_numbers = #tpu.dot_dimension_numbers<[1], [0], [0], [1], [0, 0, 1, 1], [], []>} : vector<32x256xbf16>, vector<256x128xbf16>, vector<32x128xf32> -> vector<32x128xf32>
    %7 = arith.addf %3, %6 : vector<32x128xf32>
    %c0_6 = arith.constant 0 : index
    %c0_7 = arith.constant 0 : index
    %8 = vector.load %arg7[%c0_6, %c0_7] : memref<32x128xf32, #tpu.memory_space<vmem>>, vector<32x128xf32>
    tpu.vector_store %arg7[%c0_6, %c0_7], %7 {strides = array<i32>} : memref<32x128xf32, #tpu.memory_space<vmem>>, vector<32x128xf32>,
    %c0_i32_8 = arith.constant 0 : i32
    %9 = arith.cmpi eq, %arg2, %c0_i32_8 : i32
    %10 = arith.extui %9 : i1 to i32
    %c0_i32_9 = arith.constant 0 : i32
    %11 = arith.cmpi ne, %10, %c0_i32_9 : i32
    scf.if %11 {
      %c0_10 = arith.constant 0 : index
      %c0_11 = arith.constant 0 : index
      %12 = vector.load %arg7[%c0_10, %c0_11] : memref<32x128xf32, #tpu.memory_space<vmem>>, vector<32x128xf32>
      %c0_12 = arith.constant 0 : index
      %c0_13 = arith.constant 0 : index
      %13 = vector.load %arg5[%c0_12, %c0_13] : memref<1x128xf32, #tpu.memory_space<vmem>>, vector<1x128xf32>
      %14 = vector.broadcast %13 : vector<1x128xf32> to vector<32x128xf32>
      %15 = arith.addf %12, %14 : vector<32x128xf32>
      %16 = arith.truncf %15 : vector<32x128xf32> to vector<32x128xbf16>
      %c0_14 = arith.constant 0 : index
      %c0_15 = arith.constant 0 : index
      %17 = vector.load %arg6[%c0_14, %c0_15] : memref<32x128xbf16, #tpu.memory_space<vmem>>, vector<32x128xbf16>
      tpu.vector_store %arg6[%c0_14, %c0_15], %16 {strides = array<i32>} : memref<32x128xbf16, #tpu.memory_space<vmem>>, vector<32x128xbf16>,
    } else {
    }
    return
  }
  func.func @transform_0(%arg0: i32, %arg1: i32, %arg2: i32) -> (i32, i32) {
    %c0_i32 = arith.constant 0 : i32
    return %arg0, %arg2 : i32, i32
  }
  func.func @transform_1(%arg0: i32, %arg1: i32, %arg2: i32) -> (i32, i32) {
    %c0_i32 = arith.constant 0 : i32
    return %arg2, %arg1 : i32, i32
  }
  func.func @transform_2(%arg0: i32, %arg1: i32, %arg2: i32) -> (i32, i32) {
    %c0_i32 = arith.constant 0 : i32
    %c0_i32_0 = arith.constant 0 : i32
    return %c0_i32, %arg1 : i32, i32
  }
  func.func @transform_3(%arg0: i32, %arg1: i32, %arg2: i32) -> (i32, i32) {
    %c0_i32 = arith.constant 0 : i32
    return %arg0, %arg1 : i32, i32
  }
}

</mosaic_0001>

<bundles_post_ra>
// kernel: matmul_bias.1
= control target key start
LH: loop header
LB: loop body
LE: loop exit
PB: predicated region body
PF: predicated region fallthrough
CT: control target
= control target key end

     0   :  { %s830_s12 = smov 0   ;;  %s832_s13 = smov 0   ;;  %s918_s0 = inlined_call_operand.vmem [shape: bf16[64,256], index: 0, kind: input, shape index: {}]   ;;  %s919_s1 = inlined_call_operand.vmem [shape: bf16[256,128], index: 1, kind: input, shape index: {}]   ;;  %s920_s2 = inlined_call_operand.vmem [shape: f32[1,128], index: 2, kind: input, shape index: {}]   ;;  %s921_s3 = inlined_call_operand.vmem [shape: bf16[64,128], index: 3, kind: output, shape index: {}]  }
   0x1   :  { %s834_s14 = smov 0  }
   0x2 LB: > { %s32_s15 = sadd.s32 1, %s804_s13  ;;  %p647_p0 = scmp.ge.s32.totalorder %s808_s14, 1  ;;  %s808_s14 = sphi %s834_s14, %s13_s14   ;;  %s804_s13 = sphi %s832_s13, %s923_s13   ;;  %s800_s12 = sphi %s830_s12, %s922_s12  }
   0x3   : > { %p34_p1 = scmp.ge.s32.totalorder %s32_s15, 2  ;;  %p191_p2 = scmp.lt.s32.totalorder %s808_s14, 3 }
   0x5   : > { %s925_s15 = smov (%p34_p1, %s32_s15), 0  ;;  %p192_p3 = pnand %p647_p0, %p191_p2 }
   0x6   : > { %s648_s18 = sshll.u32 (!%p192_p3), %s800_s12, 2 }
   0x7   : > { %195 = sbr.rel (%p192_p3) target bundleno = 251 (0xfb), region = 32  ;;  %p236_p4 = scmp.lt.s32.totalorder (!%p192_p3), %s648_s18, 7 }
   0xc   : > { %v764_v0 = vld [vmem:[%s919_s1 + $0x78] sm:$0xff]   ;;  %v766_v2 = vld [vmem:[%s919_s1 + $0x70] sm:$0xff]   ;;  %v768_v4 = vld [vmem:[%s919_s1 + $0x68] sm:$0xff]   ;;  %s927_s18 = smov (!%p236_p4, %s648_s18), 7 }
   0xd   : > { %v765_v1 = vld [vmem:[%s919_s1 + $0x38] sm:$0xff]   ;;  %696 = vmatprep.subr.bf16.mxu0 %v764_v0  ;;  %724 = vmatprep.subr.bf16.mxu1 %v764_v0  ;;  %v767_v3 = vld [vmem:[%s919_s1 + $0x30] sm:$0xff]   ;;  %v769_v5 = vld [vmem:[%s919_s1 + $0x28] sm:$0xff]   ;;  %s680_s6 = sshll.u32 %s927_s18, 3  ;;  %s652_s5 = sshll.u32 %s927_s18, 2 }
   0xe   : > { %697 = vmatpush3.bf16.msra.mxu0 %v765_v1  ;;  %732 = vmatpush3.bf16.msra.mxu1 %v765_v1  ;;  %v770_v6 = vld [vmem:[%s919_s1 + $0x60] sm:$0xff]   ;;  %v772_v8 = vld [vmem:[%s919_s1 + $0x58] sm:$0xff]   ;;  %s243_s11 = scalar_lea.vmem %s918_s0, %s680_s6  ;;  %v774_v10 = vld [vmem:[%s919_s1 + $0x50] sm:$0xff]   ;;  %s265_s8 = scalar_lea.vmem %s921_s3, %s652_s5 }
   0xf   : > { %698 = vmatprep.subr.bf16.mxu0 %v766_v2  ;;  %725 = vmatprep.subr.bf16.mxu1 %v766_v2  ;;  %v771_v7 = vld [vmem:[%s919_s1 + $0x20] sm:$0xff]   ;;  %v773_v9 = vld [vmem:[%s919_s1 + $0x18] sm:$0xff]   ;;  %v775_v13 = vld [vmem:[%s919_s1 + $0x10] sm:$0xff]  }
  0x10   : > { %v782_v11 = vld [vmem:[%s243_s11 + $0x4] ss:$8 sps:$4 sm:$0xff]   ;;  %v785_v12 = vld [vmem:[%s243_s11 + $0x14] ss:$8 sps:$4 sm:$0xff]   ;;  %v780_v18 = vld [vmem:[%s243_s11] ss:$8 sps:$4 sm:$0xff]  }
  0x11   : > { %v776_v14 = vld [vmem:[%s919_s1 + $0x48] sm:$0xff]   ;;  %464 = vmatprep.mubr.bf16.mxu0 %v782_v11  ;;  %472 = vmatprep.mubr.bf16.mxu1 %v785_v12  ;;  %v778_v16 = vld [vmem:[%s919_s1 + $0x40] sm:$0xff]   ;;  %v783_v19 = vld [vmem:[%s243_s11 + $0x10] ss:$8 sps:$4 sm:$0xff]  }
  0x12   : > { %699 = vmatpush3.bf16.msra.mxu0 %v767_v3  ;;  %733 = vmatpush3.bf16.msra.mxu1 %v767_v3  ;;  %v777_v15 = vld [vmem:[%s919_s1 + $0x8] sm:$0xff]   ;;  %v779_v17 = vld [vmem:[%s919_s1] sm:$0xff]  }
  0x13   : > { %700 = vmatprep.subr.bf16.mxu0 %v768_v4  ;;  %726 = vmatprep.subr.bf16.mxu1 %v768_v4  ;;  %v673_v28 = vld [vmem:[%s920_s2] ss:$0 sm:$0xff] }
  0x16   : > { %701 = vmatpush3.bf16.msra.mxu0 %v769_v5  ;;  %734 = vmatpush3.bf16.msra.mxu1 %v769_v5 }
  0x17   : > { %702 = vmatprep.subr.bf16.mxu0 %v770_v6  ;;  %727 = vmatprep.subr.bf16.mxu1 %v770_v6 }
  0x1a   : > { %703 = vmatpush3.bf16.msra.mxu0 %v771_v7  ;;  %735 = vmatpush3.bf16.msra.mxu1 %v771_v7 }
  0x1b   : > { %704 = vmatprep.subr.bf16.mxu0 %v772_v8  ;;  %728 = vmatprep.subr.bf16.mxu1 %v772_v8 }
  0x1e   : > { %705 = vmatpush3.bf16.msra.mxu0 %v773_v9  ;;  %736 = vmatpush3.bf16.msra.mxu1 %v773_v9 }
  0x1f   : > { %706 = vmatprep.subr.bf16.mxu0 %v774_v10  ;;  %729 = vmatprep.subr.bf16.mxu1 %v774_v10 }
  0x22   : > { %707 = vmatpush3.bf16.msra.mxu0 %v775_v13  ;;  %737 = vmatpush3.bf16.msra.mxu1 %v775_v13 }
  0x23   : > { %708 = vmatprep.subr.bf16.mxu0 %v776_v14  ;;  %730 = vmatprep.subr.bf16.mxu1 %v776_v14 }
  0x26   : > { %709 = vmatpush3.bf16.msra.mxu0 %v777_v15  ;;  %738 = vmatpush3.bf16.msra.mxu1 %v777_v15 }
  0x27   : > { %710 = vmatprep.subr.bf16.mxu0 %v778_v16  ;;  %731 = vmatprep.subr.bf16.mxu1 %v778_v16 }
  0x2a   : > { %711 = vmatpush3.bf16.msra.mxu0 %v779_v17  ;;  %739 = vmatpush3.bf16.msra.mxu1 %v779_v17 }
  0x2d   : > { %465 = vmatmul.mubr.bf16.vlgmr.msra.gmra.mxu0 %v780_v18  ;;  %473 = vmatmul.mubr.bf16.vlgmr.msra.gmra.mxu1 %v783_v19 }
  0xed   : > { %v712_v20 = vpop.f32.mrf.mxu0  ;;  %v718_v21 = vpop.f32.mrf.mxu1 }
  0xef   : > { %v713_v22 = vpop.f32.mrf.mxu0  ;;  %v719_v23 = vpop.f32.mrf.mxu1 }
  0xf0   : > { %v714_v26 = vadd.f32 %v713_v22, %v712_v20  ;;  %v720_v27 = vadd.f32 %v719_v23, %v718_v21 }
  0xf1   : > { %v715_v24 = vpop.f32.mrf.mxu0  ;;  %v721_v25 = vpop.f32.mrf.mxu1 }
  0xf2   : > { %v503_v33 = vadd.f32 %v714_v26, %v673_v28  ;;  %v505_v34 = vadd.f32 %v720_v27, %v673_v28 }
  0xf3   : > { %v716_v29 = vpop.f32.mrf.mxu0  ;;  %v722_v30 = vpop.f32.mrf.mxu1 }
  0xf4   : > { %v717_v31 = vadd.f32 %v716_v29, %v715_v24  ;;  %v723_v32 = vadd.f32 %v722_v30, %v721_v25 }
  0xf6   : > { %v504_v35 = vadd.f32 %v717_v31, %v673_v28  ;;  %v506_v36 = vadd.f32 %v723_v32, %v673_v28 }
  0xf8   : > { %v688_v37 = vpack.c.bf16 %v504_v35, %v503_v33  ;;  %v693_v38 = vpack.c.bf16 %v506_v36, %v505_v34 }
  0xfa   : > { %689 = vst [vmem:[%s265_s8] sm:$0xff] %v688_v37   ;;  %695 = vst [vmem:[%s265_s8 + $0x8] sm:$0xff] %v693_v38  }
  0xfb PF: > { %s13_s14 = sadd.s32 1, %s808_s14   ;;  %s922_s12 = smov %s804_s13 }
  0xfc   : > { %p10_p5 = scmp.ge.s32.totalorder %s13_s14, 4   ;;  %s923_s13 = smov %s925_s15 }
  0xfe   :  { %12 = sbr.rel (!%p10_p5) target bundleno = 2 (0x2), region = 76 }

</bundles_post_ra>
